<compile_context>
chip_gen: v7x
topology: tpu7x:2x2x1
jax: 0.10.0
libtpu: 0.0.40
codegen_flags: <defaults>
</compile_context>

<pallas_src>
import jax
import jax.numpy as jnp
from jax.experimental import pallas as pl
from jax.experimental.pallas import tpu as pltpu


def _adversary_kernel(x_ref, wt_ref, b_ref, o_ref):
    """x_ref: (TR, H) row tile; wt_ref: (H, L) resident; b_ref: (1, L); o_ref: (TR, L)."""
    # Natural MK x KN matmul on the MXU, f32 accumulation.
    logits = jnp.dot(x_ref[...], wt_ref[...], preferred_element_type=jnp.float32)
    logits = logits + b_ref[...].astype(jnp.float32)

    # Numerically stable log-softmax over the language (last / lane) axis, f32.
    m = jnp.max(logits, axis=-1, keepdims=True)
    shifted = logits - m
    lse = jnp.log(jnp.sum(jnp.exp(shifted), axis=-1, keepdims=True))
    o_ref[...] = (shifted - lse).astype(o_ref.dtype)


def _round_up(x, m):
    return ((x + m - 1) // m) * m


def _vmem_capacity_bytes():
    """Trace-time VMEM capacity; conservative 64 MiB (v7x) fallback."""
    try:
        info = pltpu.get_tpu_info()
        cap = getattr(info, "vmem_capacity_bytes", None)
        if cap:
            return int(cap)
    except Exception:
        pass
    return 64 << 20


def _pick_row_tile(rows, hidden, x_itemsize, per_buf_target, tr_cap=4096):
    """Row-tile size (multiple of 128) from a per-buffer byte target."""
    if rows <= 128:
        return rows                       # single block == full array dims (legal)
    tr = per_buf_target // max(1, hidden * x_itemsize)
    tr = max(128, (tr // 128) * 128)
    tr = min(tr, tr_cap)
    # Ensure at least 2 grid steps so v7x's two TensorCores both get work.
    two_way = _round_up(-(-rows // 2), 128)
    tr = min(tr, max(128, two_way))
    return tr


def simple_adversary_forward(inputs, weight, bias):
    """inputs: (..., hidden); weight: (language, hidden); bias: (language,).

    Returns log_softmax(inputs @ weight.T + bias) over the last axis, in the
    input dtype (matches the PyTorch module's forward).
    """
    hidden = inputs.shape[-1]
    language = weight.shape[0]
    lead_shape = inputs.shape[:-1]

    x2d = inputs.reshape(-1, hidden)      # native dtype; no pad, no upcast
    rows = x2d.shape[0]

    # Tiny one-time transpose of the (language, hidden) weight -> stationary RHS.
    w_t = weight.T                        # (hidden, language)
    b2d = bias.reshape(1, language)

    x_item = jnp.dtype(x2d.dtype).itemsize
    w_item = jnp.dtype(w_t.dtype).itemsize
    out_dtype = inputs.dtype
    out_item = jnp.dtype(out_dtype).itemsize

    cap = _vmem_capacity_bytes()
    if cap <= (64 << 20):                 # v7x-class: 64 MiB VMEM per TC
        per_buf_target, vmem_ceiling = 12 << 20, 48 << 20
    else:                                 # v5e / v6e: 128 MiB VMEM
        per_buf_target, vmem_ceiling = 24 << 20, 96 << 20

    tr = _pick_row_tile(rows, hidden, x_item, per_buf_target)
    grid = (pl.cdiv(rows, tr),)

    # Honest VMEM accounting: double-buffered x & out tiles + resident W^T and
    # bias + a little slack for compiler-internal scratch.
    vmem_needed = (2 * tr * hidden * x_item
                   + 2 * tr * language * out_item
                   + hidden * language * w_item
                   + language * 4
                   + (2 << 20))
    vmem_limit = int(min(max(vmem_needed, 4 << 20), vmem_ceiling))

    out = pl.pallas_call(
        _adversary_kernel,
        out_shape=jax.ShapeDtypeStruct((rows, language), out_dtype),
        grid_spec=pltpu.PrefetchScalarGridSpec(
            num_scalar_prefetch=0,
            grid=grid,
            in_specs=[
                pl.BlockSpec((tr, hidden), lambda i: (i, 0)),         # x row tiles
                pl.BlockSpec((hidden, language), lambda i: (0, 0)),   # W^T resident
                pl.BlockSpec((1, language), lambda i: (0, 0)),        # bias resident
            ],
            out_specs=pl.BlockSpec((tr, language), lambda i: (i, 0)),
        ),
        compiler_params=pltpu.CompilerParams(
            dimension_semantics=("parallel",),   # shard row tiles over v7x's 2 TCs
            vmem_limit_bytes=vmem_limit,
        ),
    )(x2d, w_t, b2d)

    return out.reshape(*lead_shape, language)


def _xavier_uniform(key, out_features, in_features):
    # Matches torch.nn.init.xavier_uniform_ (gain=1).
    bound = (6.0 / (in_features + out_features)) ** 0.5
    return jax.random.uniform(
        key, (out_features, in_features), dtype=jnp.float32,
        minval=-bound, maxval=bound)


if __name__ == "__main__":
    batch, seq, hidden, language = 2, 8, 32, 8

    key = jax.random.PRNGKey(0)
    k_x, k_w, k_b, k_x2 = jax.random.split(key, 4)

    inputs = jax.random.normal(k_x, (batch, seq, hidden), dtype=jnp.float32)
    weight = _xavier_uniform(k_w, language, hidden)
    # nn.Linear default bias init: U(-1/sqrt(fan_in), 1/sqrt(fan_in))
    b_bound = 1.0 / (hidden ** 0.5)
    bias = jax.random.uniform(k_b, (language,), dtype=jnp.float32,
                              minval=-b_bound, maxval=b_bound)

    out = simple_adversary_forward(inputs, weight, bias)
    out = jax.block_until_ready(out)

    ref = jax.nn.log_softmax(inputs @ weight.T + bias, axis=-1)
    assert out.shape == (batch, seq, language)
    assert jnp.allclose(out, ref, atol=1e-4, rtol=1e-4), "mismatch vs JAX reference"

    # Second check: rows not a multiple of the tile / of 8 -> exercises the
    # no-pad partial-block path (last block masked on writeback).
    inputs2 = jax.random.normal(k_x2, (300, hidden), dtype=jnp.float32)
    out2 = jax.block_until_ready(simple_adversary_forward(inputs2, weight, bias))
    ref2 = jax.nn.log_softmax(inputs2 @ weight.T + bias, axis=-1)
    assert out2.shape == (300, language)
    assert jnp.allclose(out2, ref2, atol=1e-4, rtol=1e-4), "mismatch (partial block)"

    print("KERNEL_OK")
</pallas_src>

<mosaic_0001>
module attributes {stable_mosaic.version = 11 : i64} {
  func.func @_adversary_kernel(%arg0: i32, %arg1: memref<16x32xf32, #tpu.memory_space<vmem>>, %arg2: memref<32x8xf32, #tpu.memory_space<vmem>>, %arg3: memref<1x8xf32, #tpu.memory_space<vmem>>, %arg4: memref<16x8xf32, #tpu.memory_space<vmem>>) attributes {dimension_semantics = [#tpu.dimension_semantics<parallel>], iteration_bounds = array<i64: 1>, scalar_prefetch = 0 : i64, scratch_operands = 0 : i64, tpu.core_type = #tpu.core_type<tc>, window_params = [{transform_indices = @transform_0, window_bounds = array<i64: 16, 32>}, {pipeline_mode = #tpu.pipeline_mode<synchronous>, transform_indices = @transform_1, window_bounds = array<i64: 32, 8>}, {pipeline_mode = #tpu.pipeline_mode<synchronous>, transform_indices = @transform_2, window_bounds = array<i64: 1, 8>}, {transform_indices = @transform_3, window_bounds = array<i64: 16, 8>}]} {
    %c0 = arith.constant 0 : index
    %c0_0 = arith.constant 0 : index
    %0 = vector.load %arg1[%c0, %c0_0] : memref<16x32xf32, #tpu.memory_space<vmem>>, vector<16x32xf32>
    %c0_1 = arith.constant 0 : index
    %c0_2 = arith.constant 0 : index
    %1 = vector.load %arg2[%c0_1, %c0_2] : memref<32x8xf32, #tpu.memory_space<vmem>>, vector<32x8xf32>
    %cst = arith.constant dense<0.000000e+00> : vector<16x8xf32>
    %2 = tpu.matmul %0, %1, %cst {dimension_numbers = #tpu.dot_dimension_numbers<[1], [0], [0], [1], [0, 0, 1, 1], [], []>} : vector<16x32xf32>, vector<32x8xf32>, vector<16x8xf32> -> vector<16x8xf32>
    %c0_3 = arith.constant 0 : index
    %c0_4 = arith.constant 0 : index
    %3 = vector.load %arg3[%c0_3, %c0_4] : memref<1x8xf32, #tpu.memory_space<vmem>>, vector<1x8xf32>
    %4 = vector.broadcast %3 : vector<1x8xf32> to vector<16x8xf32>
    %5 = arith.addf %2, %4 : vector<16x8xf32>
    %cst_5 = arith.constant dense<0xFF800000> : vector<16xf32>
    %6 = vector.multi_reduction <maximumf>, %5, %cst_5 [1] : vector<16x8xf32> to vector<16xf32>
    %7 = vector.shape_cast %6 : vector<16xf32> to vector<16x1xf32>
    %8 = vector.broadcast %7 : vector<16x1xf32> to vector<16x8xf32>
    %9 = arith.subf %5, %8 : vector<16x8xf32>
    %10 = math.exp %9 : vector<16x8xf32>
    %cst_6 = arith.constant dense<0.000000e+00> : vector<16xf32>
    %11 = vector.multi_reduction <add>, %10, %cst_6 [1] : vector<16x8xf32> to vector<16xf32>
    %12 = vector.shape_cast %11 : vector<16xf32> to vector<16x1xf32>
    %13 = math.log %12 : vector<16x1xf32>
    %14 = vector.broadcast %13 : vector<16x1xf32> to vector<16x8xf32>
    %15 = arith.subf %9, %14 : vector<16x8xf32>
    %c0_7 = arith.constant 0 : index
    %c0_8 = arith.constant 0 : index
    %16 = vector.load %arg4[%c0_7, %c0_8] : memref<16x8xf32, #tpu.memory_space<vmem>>, vector<16x8xf32>
    tpu.vector_store %arg4[%c0_7, %c0_8], %15 {strides = array<i32>} : memref<16x8xf32, #tpu.memory_space<vmem>>, vector<16x8xf32>,
    return
  }
  func.func @transform_0(%arg0: i32) -> (i32, i32) {
    %c0_i32 = arith.constant 0 : i32
    %c0_i32_0 = arith.constant 0 : i32
    return %arg0, %c0_i32 : i32, i32
  }
  func.func @transform_1(%arg0: i32) -> (i32, i32) {
    %c0_i32 = arith.constant 0 : i32
    %c0_i32_0 = arith.constant 0 : i32
    %c0_i32_1 = arith.constant 0 : i32
    return %c0_i32, %c0_i32_0 : i32, i32
  }
  func.func @transform_2(%arg0: i32) -> (i32, i32) {
    %c0_i32 = arith.constant 0 : i32
    %c0_i32_0 = arith.constant 0 : i32
    %c0_i32_1 = arith.constant 0 : i32
    return %c0_i32, %c0_i32_0 : i32, i32
  }
  func.func @transform_3(%arg0: i32) -> (i32, i32) {
    %c0_i32 = arith.constant 0 : i32
    %c0_i32_0 = arith.constant 0 : i32
    return %arg0, %c0_i32 : i32, i32
  }
}

</mosaic_0001>

<bundles_post_ra>
// kernel: tpu_custom_call.1
= control target key start
LH: loop header
LB: loop body
LE: loop exit
PB: predicated region body
PF: predicated region fallthrough
CT: control target
= control target key end

     0   :  { %vm27_vm0 = vcmask 261120   ;;  %vm109_vm1 = vcmask 64512   ;;  %s229_s1 = inlined_call_operand.vmem [shape: f32[32,8], index: 1, kind: input, shape index: {}]   ;;  %s230_s0 = inlined_call_operand.vmem [shape: f32[16,32], index: 0, kind: input, shape index: {}]   ;;  %s231_s2 = inlined_call_operand.vmem [shape: f32[1,8], index: 2, kind: input, shape index: {}]   ;;  %s232_s3 = inlined_call_operand.vmem [shape: f32[16,8], index: 3, kind: output, shape index: {}]  }
   0x1   :  { %v16_v0 = vld [vmem:[%s229_s1] sm:$0xff]  ;;  %v17_v1 = vld [vmem:[%s229_s1 + $0x8] sm:$0xff]  ;;  %v18_v2 = vld [vmem:[%s229_s1 + $0x10] sm:$0xff] }
   0x2   :  { %v160_v3 = vpack.c.bf16 %v17_v1, %v16_v0  ;;  %v19_v4 = vld [vmem:[%s229_s1 + $0x18] sm:$0xff]  ;;  %v14_v5 = vld [vmem:[%s230_s0] sm:$0xff]  ;;  %v15_v7 = vld [vmem:[%s230_s0 + $0x8] sm:$0xff] }
   0x3   :  { %v164_v6 = vpack.c.bf16 %v19_v4, %v18_v2  ;;  %157 = vmatprep.mubr.msk.f32.mxu0 %vm27_vm0, %v14_v5  ;;  %v140_v8 = vld [vmem:[%s231_s2] ss:$0 sm:$0xff] }
   0x4   :  { %161 = vmatprep.subr.bf16.mxu0 %v160_v3 }
   0x5   :  { %163 = vmatpush3.bf16.msra.mxu0 %v160_v3 }
   0x6   :  { %165 = vmatprep.subr.bf16.mxu0 %v164_v6 }
   0x9   :  { %167 = vmatpush3.bf16.msra.mxu0 %v164_v6 }
   0xc   :  { %158 = vmatmul.mubr.msk.f32.vlgmr.msra.gmra.mrb[0].mxu0 %vm27_vm0, %v15_v7 }
  0xdf   :  { %v159_v9 = vpop.f32.mrb[0].mxu0 }
  0xe0   :  { %v100_v10 = vpop.f32.mrb[1].mxu0  ;;  %v106_v12 = vadd.f32 %v159_v9, %v140_v8 }
  0xe1   :  { %v101_v11 = vadd.f32 %v140_v8, %v100_v10 }
  0xe2   :  { %v113_v14 = vsel %vm109_vm1, %v106_v12, -inf }
  0xe3   :  { %v110_v13 = vsel %vm109_vm1, %v101_v11, -inf }
  0xe4   :  { %111 = vmax.xlane.f32.xlu0 %v110_v13 }
  0xe8   :  { %114 = vmax.xlane.f32.xlu0 %v113_v14 }
 0x171   :  { %v112_v15 = vpop.xlane.xlu0 %111 }
 0x172   :  { %v116_v16 = vsub.f32 %v101_v11, %v112_v15 }
 0x174   :  { %v118_v17 = vmul.f32 1.442695, %v116_v16 }
 0x175   :  { %v115_v18 = vpop.xlane.xlu0 %114 }
 0x176   :  { %168 = vpow2.f32 %v118_v17  ;;  %v117_v19 = vsub.f32 %v106_v12, %v115_v18 }
 0x178   :  { %v120_v20 = vmul.f32 1.442695, %v117_v19 }
 0x17a   :  { %170 = vpow2.f32 %v120_v20 }
 0x180   :  { %v169_v21 = vpop.eup %168 }
 0x181   :  { %v122_v22 = vsel %vm109_vm1, %v169_v21, 0.0 }
 0x182   :  { %123 = vadd.xlane.f32.xlu1 %v122_v22 }
 0x184   :  { %v171_v23 = vpop.eup %170 }
 0x185   :  { %v125_v24 = vsel %vm109_vm1, %v171_v23, 0.0 }
 0x186   :  { %126 = vadd.xlane.f32.xlu1 %v125_v24 }
 0x20f   :  { %v124_v25 = vpop.xlane.xlu1 %123 }
 0x210   :  { %172 = vlog2.f32 %v124_v25 }
 0x213   :  { %v127_v26 = vpop.xlane.xlu1 %126 }
 0x214   :  { %174 = vlog2.f32 %v127_v26 }
 0x21a   :  { %v173_v27 = vpop.eup %172 }
 0x21b   :  { %v129_v28 = vmul.f32 0.6931472, %v173_v27 }
 0x21d   :  { %v132_v29 = vsub.f32 %v116_v16, %v129_v28 }
 0x21e   :  { %v175_v30 = vpop.eup %174 }
 0x21f   :  { %134 = vst.msk [vmem:[%s232_s3] sm:$0xff] %vm109_vm1, %v132_v29  ;;  %v131_v31 = vmul.f32 0.6931472, %v175_v30 }
 0x221   :  { %v133_v32 = vsub.f32 %v117_v19, %v131_v31 }
 0x223   :  { %135 = vst.msk [vmem:[%s232_s3 + $0x8] sm:$0xff] %vm109_vm1, %v133_v32 }

</bundles_post_ra>
